<compile_context>
chip_gen: v7x
topology: tpu7x:2x2x1
jax: 0.10.0
libtpu: 0.0.40
codegen_flags: <defaults>
</compile_context>

<pallas_src>
import functools

import numpy as np
import jax
import jax.numpy as jnp
from jax import lax
from jax.experimental import pallas as pl
from jax.experimental.pallas import tpu as pltpu

_BN_EPS = 1e-5


def _vmem_limit_bytes(block_bytes):
    """Per-generation VMEM limit: <=75% of physical (v7x has only 64 MiB/TC)."""
    cap = 64 * 1024 * 1024
    try:
        cap = int(getattr(pltpu.get_tpu_info(), "vmem_capacity_bytes", cap)) or cap
    except Exception:
        pass
    return int(min(int(0.75 * cap), max(16 * 1024 * 1024, 6 * int(block_bytes))))


# ---------- pass 1: binary 3x3 conv + residual 1x1 conv + one-pass BN statistics ----------
def _pass1_kernel(*refs, stride, downsample, Ho, Wo):
    if downsample:
        xs_ref, pooled_ref, wb_ref, wd_ref, body_ref, res_ref, stats_ref = refs
    else:
        xs_ref, wb_ref, body_ref, stats_ref = refs

    Cin = xs_ref.shape[-1]
    M = Ho * Wo
    f32 = jnp.float32

    if stride == 2:
        # Space-to-depth parity planes prepared in the wrapper: unit-stride access only.
        planes = [xs_ref[p] for p in range(4)]

    def tap(ky, kx):
        if stride == 1:
            t = xs_ref[pl.ds(ky, Ho), pl.ds(kx, Wo), :]
        else:
            pln = planes[(ky % 2) * 2 + (kx % 2)]
            t = lax.slice(pln, (ky // 2, kx // 2, 0), (ky // 2 + Ho, kx // 2 + Wo, Cin))
        return t.reshape(M, Cin)

    # Binarized 3x3 conv: 9 accumulated bf16 MXU dots (no lane-misaligned im2col concat).
    # xs holds sign(x) with a zero border (sign applied BEFORE padding) -> padded taps
    # contribute exactly 0; f32 accumulation of +/-1 products is exact.
    body = jnp.dot(tap(0, 0), wb_ref[0], preferred_element_type=f32)
    for k in range(1, 9):
        ky, kx = divmod(k, 3)
        body = body + jnp.dot(tap(ky, kx), wb_ref[k], preferred_element_type=f32)

    body_ref[...] = body.astype(body_ref.dtype)      # bf16 when exact (9*Cin <= 256)
    stats = [jnp.sum(body, axis=0, keepdims=True),
             jnp.sum(body * body, axis=0, keepdims=True)]

    if downsample:
        # AvgPool2d already done in XLA; only the full-precision 1x1 conv here.
        res = jnp.dot(pooled_ref[...], wd_ref[...], preferred_element_type=f32)
        res_ref[...] = res
        stats.append(jnp.sum(res, axis=0, keepdims=True))
        stats.append(jnp.sum(res * res, axis=0, keepdims=True))

    stats_ref[...] = jnp.concatenate(stats, axis=0)  # (2 or 4, CT)


# ---------- pass 2: fused BN-affine + residual add (lane-dense elementwise epilogue) ----------
def _pass2_kernel(body_ref, res_ref, aff_ref, o_ref):
    aff = aff_ref[...]                               # (3, Wo*Cout): [scale_b, scale_r, shift]
    o_ref[...] = (body_ref[...].astype(jnp.float32) * aff[0:1, :]
                  + res_ref[...] * aff[1:2, :]
                  + aff[2:3, :])


def basic_block_forward(x_nchw, params, stride):
    """Pallas implementation. x_nchw: (N, Cin, H, W) float32 -> (N, Cout, Ho, Wo)."""
    N, Cin, H, W = x_nchw.shape
    Cout = params["w_body"].shape[0]
    downsample = Cin != Cout
    if downsample:
        # Only shape-consistent downsample configuration of the PyTorch module.
        assert stride == 2 and H % 2 == 0 and W % 2 == 0, "downsample block needs stride=2, even H/W"
    else:
        assert stride == 1, "identity residual requires stride == 1"
    Ho, Wo = H // stride, W // stride
    M = Ho * Wo
    L = Wo * Cout                                    # lane-flat layout for pass 2
    Hp, Wp = H + 2, W + 2
    f32, bf16 = jnp.float32, jnp.bfloat16
    body_dtype = bf16 if 9 * Cin <= 256 else f32     # bf16 only where it is exact

    # ---- layout / quantization work hoisted out of the kernels (XLA side) ----
    x_nhwc = jnp.transpose(x_nchw, (0, 2, 3, 1)).astype(f32)
    xs = jnp.where(x_nhwc >= 0, 1.0, -1.0).astype(bf16)               # sign BEFORE padding
    xs_pad = jnp.pad(xs, ((0, 0), (1, 1), (1, 1), (0, 0)))            # zero border -> contributes 0

    if stride == 2:
        Hp2, Wp2 = Hp // 2, Wp // 2
        xs_in = (xs_pad.reshape(N, Hp2, 2, Wp2, 2, Cin)               # space-to-depth parity planes
                 .transpose(0, 2, 4, 1, 3, 5)
                 .reshape(N, 4, Hp2, Wp2, Cin))
        xs_spec = pl.BlockSpec((None, 4, Hp2, Wp2, Cin), lambda n, j: (n, 0, 0, 0, 0))
        xs_bytes = 4 * Hp2 * Wp2 * Cin * 2
    else:
        xs_in = xs_pad
        xs_spec = pl.BlockSpec((None, Hp, Wp, Cin), lambda n, j: (n, 0, 0, 0))
        xs_bytes = Hp * Wp * Cin * 2

    wb = jnp.where(params["w_body"] >= 0, 1.0, -1.0).astype(bf16)     # OIHW signs
    wb9 = jnp.transpose(wb, (2, 3, 1, 0)).reshape(9, Cin, Cout)       # (tap=ky*3+kx, Cin, Cout)

    CT = 128 if Cout % 128 == 0 else Cout                             # Cout tile (bounds v7x VMEM)
    n_ct = Cout // CT
    grid1 = (N, n_ct)

    in_arrays, in_specs = [xs_in], [xs_spec]
    if downsample:
        pooled = lax.reduce_window(x_nhwc, 0.0, lax.add, (1, 2, 2, 1),
                                   (1, stride, stride, 1), "VALID") * 0.25
        pooled = pooled.reshape(N, M, Cin)                            # pre-pooled in XLA (4x less DMA)
        in_arrays.append(pooled)
        in_specs.append(pl.BlockSpec((None, M, Cin), lambda n, j: (n, 0, 0)))
    in_arrays.append(wb9)
    in_specs.append(pl.BlockSpec((9, Cin, CT), lambda n, j: (0, 0, j)))
    if downsample:
        wd = params["w_down"][:, :, 0, 0].T.astype(f32)               # (Cin, Cout)
        in_arrays.append(wd)
        in_specs.append(pl.BlockSpec((Cin, CT), lambda n, j: (0, j)))

    n_stats = 4 if downsample else 2
    out_shapes = [jax.ShapeDtypeStruct((N, M, Cout), body_dtype)]
    out_specs = [pl.BlockSpec((None, M, CT), lambda n, j: (n, 0, j))]
    if downsample:
        out_shapes.append(jax.ShapeDtypeStruct((N, M, Cout), f32))
        out_specs.append(pl.BlockSpec((None, M, CT), lambda n, j: (n, 0, j)))
    out_shapes.append(jax.ShapeDtypeStruct((N, n_stats, Cout), f32))
    out_specs.append(pl.BlockSpec((None, n_stats, CT), lambda n, j: (n, 0, j)))

    blk1_bytes = xs_bytes + 9 * Cin * CT * 2 + M * CT * 2 + n_stats * CT * 4 + M * Cin * 2
    if downsample:
        blk1_bytes += M * Cin * 4 + Cin * CT * 4 + M * CT * 4

    pass1 = pl.pallas_call(
        functools.partial(_pass1_kernel, stride=stride, downsample=downsample, Ho=Ho, Wo=Wo),
        out_shape=tuple(out_shapes),
        grid=grid1,
        in_specs=in_specs,
        out_specs=tuple(out_specs),
        compiler_params=pltpu.CompilerParams(
            dimension_semantics=("parallel", "parallel"),
            vmem_limit_bytes=_vmem_limit_bytes(blk1_bytes)),
    )(*in_arrays)

    if downsample:
        body_pre, res_pre, stats = pass1
    else:
        body_pre, stats = pass1

    # ---- fold training-mode batch statistics into per-channel (scale, shift) affines ----
    m_total = N * M
    tot = jnp.sum(stats, axis=0)                                      # (n_stats, Cout)
    mu_b = tot[0] / m_total
    var_b = jnp.maximum(tot[1] / m_total - mu_b * mu_b, 0.0)
    scale_b = params["gamma_body"].astype(f32) * lax.rsqrt(var_b + _BN_EPS)
    shift_b = params["beta_body"].astype(f32) - mu_b * scale_b

    if downsample:
        mu_r = tot[2] / m_total
        var_r = jnp.maximum(tot[3] / m_total - mu_r * mu_r, 0.0)
        scale_r = params["gamma_down"].astype(f32) * lax.rsqrt(var_r + _BN_EPS)
        shift_r = params["beta_down"].astype(f32) - mu_r * scale_r
        res_in = res_pre.reshape(N, Ho, L)                            # free contiguous reshape
    else:
        scale_r = jnp.ones((Cout,), f32)
        shift_r = jnp.zeros((Cout,), f32)
        res_in = x_nhwc.reshape(N, Ho, L)                             # no padded copy of x

    shift = shift_b + shift_r                                         # single fused shift
    affine = jnp.stack([jnp.tile(scale_b, Wo), jnp.tile(scale_r, Wo),
                        jnp.tile(shift, Wo)], axis=0)                 # (3, Wo*Cout)
    body_in = body_pre.reshape(N, Ho, L)                              # lane-flat view, no copy

    blk2_bytes = Ho * L * (2 + 4 + 4) + 3 * L * 4
    out_flat = pl.pallas_call(
        _pass2_kernel,
        out_shape=jax.ShapeDtypeStruct((N, Ho, L), f32),
        grid=(N,),
        in_specs=[pl.BlockSpec((None, Ho, L), lambda n: (n, 0, 0)),
                  pl.BlockSpec((None, Ho, L), lambda n: (n, 0, 0)),
                  pl.BlockSpec((3, L), lambda n: (0, 0))],
        out_specs=pl.BlockSpec((None, Ho, L), lambda n: (n, 0, 0)),
        compiler_params=pltpu.CompilerParams(
            dimension_semantics=("parallel",),
            vmem_limit_bytes=_vmem_limit_bytes(blk2_bytes)),
    )(body_in, res_in, affine)

    return jnp.transpose(out_flat.reshape(N, Ho, Wo, Cout), (0, 3, 1, 2))   # back to NCHW


# ---------------- pure-JAX reference (for correctness check) ----------------
def _bn_train(z, g, b):
    mu = jnp.mean(z, axis=(0, 1, 2), keepdims=True)
    var = jnp.mean(jnp.square(z - mu), axis=(0, 1, 2), keepdims=True)
    return (z - mu) * lax.rsqrt(var + _BN_EPS) * g + b


def basic_block_reference(x_nchw, params, stride):
    Cin = x_nchw.shape[1]
    Cout = params["w_body"].shape[0]
    x = jnp.transpose(x_nchw, (0, 2, 3, 1)).astype(jnp.float32)
    xs = jnp.where(x >= 0, 1.0, -1.0)
    ws = jnp.where(params["w_body"] >= 0, 1.0, -1.0).transpose(2, 3, 1, 0)    # HWIO
    z = lax.conv_general_dilated(xs, ws, (stride, stride), ((1, 1), (1, 1)),
                                 dimension_numbers=("NHWC", "HWIO", "NHWC"),
                                 precision=lax.Precision.HIGHEST)
    z = _bn_train(z, params["gamma_body"], params["beta_body"])
    if Cin != Cout:
        p = lax.reduce_window(x, 0.0, lax.add, (1, 2, 2, 1), (1, stride, stride, 1),
                              "VALID") * 0.25
        r = jnp.einsum("nhwc,cd->nhwd", p, params["w_down"][:, :, 0, 0].T,
                       precision=lax.Precision.HIGHEST)
        r = _bn_train(r, params["gamma_down"], params["beta_down"])
    else:
        r = x
    return jnp.transpose(z + r, (0, 3, 1, 2))


if __name__ == "__main__":
    # --- Config 1: downsampling block (Cin != Cout, stride = 2), as used in ResNet-E ---
    N, Cin, Cout, H, W, stride = 2, 4, 8, 16, 16, 2
    ks = jax.random.split(jax.random.PRNGKey(0), 8)
    x = jax.random.normal(ks[0], (N, Cin, H, W), jnp.float32)
    params = dict(
        w_body=jax.random.normal(ks[1], (Cout, Cin, 3, 3), jnp.float32) * 0.1,
        gamma_body=jax.random.uniform(ks[2], (Cout,), minval=0.5, maxval=1.5),
        beta_body=jax.random.normal(ks[3], (Cout,), jnp.float32) * 0.1,
        w_down=jax.random.normal(ks[4], (Cout, Cin, 1, 1), jnp.float32) * 0.1,
        gamma_down=jax.random.uniform(ks[5], (Cout,), minval=0.5, maxval=1.5),
        beta_down=jax.random.normal(ks[6], (Cout,), jnp.float32) * 0.1,
    )
    out = jax.block_until_ready(basic_block_forward(x, params, stride))
    ref = jax.block_until_ready(basic_block_reference(x, params, stride))
    assert out.shape == (N, Cout, H // stride, W // stride)
    np.testing.assert_allclose(np.asarray(out), np.asarray(ref), atol=1e-2, rtol=1e-2)

    # --- Config 2: identity-residual block (Cin == Cout, stride = 1) ---
    N2, C2, H2, W2 = 2, 8, 16, 16
    ks2 = jax.random.split(jax.random.PRNGKey(1), 4)
    x2 = jax.random.normal(ks2[0], (N2, C2, H2, W2), jnp.float32)
    params2 = dict(
        w_body=jax.random.normal(ks2[1], (C2, C2, 3, 3), jnp.float32) * 0.1,
        gamma_body=jax.random.uniform(ks2[2], (C2,), minval=0.5, maxval=1.5),
        beta_body=jax.random.normal(ks2[3], (C2,), jnp.float32) * 0.1,
    )
    out2 = jax.block_until_ready(basic_block_forward(x2, params2, 1))
    ref2 = jax.block_until_ready(basic_block_reference(x2, params2, 1))
    assert out2.shape == (N2, C2, H2, W2)
    np.testing.assert_allclose(np.asarray(out2), np.asarray(ref2), atol=1e-2, rtol=1e-2)

    print("KERNEL_OK")
</pallas_src>

<mosaic_0001>
module attributes {stable_mosaic.version = 11 : i64} {
  func.func @_pass1_kernel(%arg0: i32, %arg1: i32, %arg2: memref<1x4x9x9x4xbf16, #tpu.memory_space<vmem>>, %arg3: memref<1x64x4xf32, #tpu.memory_space<vmem>>, %arg4: memref<9x4x8xbf16, #tpu.memory_space<vmem>>, %arg5: memref<4x8xf32, #tpu.memory_space<vmem>>, %arg6: memref<1x64x8xbf16, #tpu.memory_space<vmem>>, %arg7: memref<1x64x8xf32, #tpu.memory_space<vmem>>, %arg8: memref<1x4x8xf32, #tpu.memory_space<vmem>>) attributes {dimension_semantics = [#tpu.dimension_semantics<parallel>, #tpu.dimension_semantics<parallel>], iteration_bounds = array<i64: 2, 1>, scalar_prefetch = 0 : i64, scratch_operands = 0 : i64, tpu.core_type = #tpu.core_type<tc>, window_params = [{transform_indices = @transform_0, window_bounds = array<i64: 1, 4, 9, 9, 4>}, {transform_indices = @transform_1, window_bounds = array<i64: 1, 64, 4>}, {transform_indices = @transform_2, window_bounds = array<i64: 9, 4, 8>}, {transform_indices = @transform_3, window_bounds = array<i64: 4, 8>}, {transform_indices = @transform_4, window_bounds = array<i64: 1, 64, 8>}, {transform_indices = @transform_5, window_bounds = array<i64: 1, 64, 8>}, {transform_indices = @transform_6, window_bounds = array<i64: 1, 4, 8>}]} {
    %c0 = arith.constant 0 : index
    %c0_0 = arith.constant 0 : index
    %c0_1 = arith.constant 0 : index
    %c0_2 = arith.constant 0 : index
    %c0_3 = arith.constant 0 : index
    %0 = vector.load %arg2[%c0, %c0_0, %c0_1, %c0_2, %c0_3] : memref<1x4x9x9x4xbf16, #tpu.memory_space<vmem>>, vector<1x1x9x9x4xbf16>
    %1 = vector.shape_cast %0 : vector<1x1x9x9x4xbf16> to vector<9x9x4xbf16>
    %c0_4 = arith.constant 0 : index
    %c1 = arith.constant 1 : index
    %c0_5 = arith.constant 0 : index
    %c0_6 = arith.constant 0 : index
    %c0_7 = arith.constant 0 : index
    %2 = vector.load %arg2[%c0_4, %c1, %c0_5, %c0_6, %c0_7] : memref<1x4x9x9x4xbf16, #tpu.memory_space<vmem>>, vector<1x1x9x9x4xbf16>
    %3 = vector.shape_cast %2 : vector<1x1x9x9x4xbf16> to vector<9x9x4xbf16>
    %c0_8 = arith.constant 0 : index
    %c2 = arith.constant 2 : index
    %c0_9 = arith.constant 0 : index
    %c0_10 = arith.constant 0 : index
    %c0_11 = arith.constant 0 : index
    %4 = vector.load %arg2[%c0_8, %c2, %c0_9, %c0_10, %c0_11] : memref<1x4x9x9x4xbf16, #tpu.memory_space<vmem>>, vector<1x1x9x9x4xbf16>
    %5 = vector.shape_cast %4 : vector<1x1x9x9x4xbf16> to vector<9x9x4xbf16>
    %c0_12 = arith.constant 0 : index
    %c3 = arith.constant 3 : index
    %c0_13 = arith.constant 0 : index
    %c0_14 = arith.constant 0 : index
    %c0_15 = arith.constant 0 : index
    %6 = vector.load %arg2[%c0_12, %c3, %c0_13, %c0_14, %c0_15] : memref<1x4x9x9x4xbf16, #tpu.memory_space<vmem>>, vector<1x1x9x9x4xbf16>
    %7 = vector.shape_cast %6 : vector<1x1x9x9x4xbf16> to vector<9x9x4xbf16>
    %8 = vector.extract_strided_slice %1 {offsets = [0, 0, 0], sizes = [8, 8, 4], strides = [1, 1, 1]} : vector<9x9x4xbf16> to vector<8x8x4xbf16>
    %9 = vector.shape_cast %8 : vector<8x8x4xbf16> to vector<64x4xbf16>
    %c0_16 = arith.constant 0 : index
    %c0_17 = arith.constant 0 : index
    %c0_18 = arith.constant 0 : index
    %10 = vector.load %arg4[%c0_16, %c0_17, %c0_18] : memref<9x4x8xbf16, #tpu.memory_space<vmem>>, vector<1x4x8xbf16>
    %11 = vector.shape_cast %10 : vector<1x4x8xbf16> to vector<4x8xbf16>
    %cst = arith.constant dense<0.000000e+00> : vector<64x8xf32>
    %12 = tpu.matmul %9, %11, %cst {dimension_numbers = #tpu.dot_dimension_numbers<[1], [0], [0], [1], [0, 0, 1, 1], [], []>} : vector<64x4xbf16>, vector<4x8xbf16>, vector<64x8xf32> -> vector<64x8xf32>
    %13 = vector.extract_strided_slice %3 {offsets = [0, 0, 0], sizes = [8, 8, 4], strides = [1, 1, 1]} : vector<9x9x4xbf16> to vector<8x8x4xbf16>
    %14 = vector.shape_cast %13 : vector<8x8x4xbf16> to vector<64x4xbf16>
    %c1_19 = arith.constant 1 : index
    %c0_20 = arith.constant 0 : index
    %c0_21 = arith.constant 0 : index
    %15 = vector.load %arg4[%c1_19, %c0_20, %c0_21] : memref<9x4x8xbf16, #tpu.memory_space<vmem>>, vector<1x4x8xbf16>
    %16 = vector.shape_cast %15 : vector<1x4x8xbf16> to vector<4x8xbf16>
    %cst_22 = arith.constant dense<0.000000e+00> : vector<64x8xf32>
    %17 = tpu.matmul %14, %16, %cst_22 {dimension_numbers = #tpu.dot_dimension_numbers<[1], [0], [0], [1], [0, 0, 1, 1], [], []>} : vector<64x4xbf16>, vector<4x8xbf16>, vector<64x8xf32> -> vector<64x8xf32>
    %18 = arith.addf %12, %17 : vector<64x8xf32>
    %19 = vector.extract_strided_slice %1 {offsets = [0, 1, 0], sizes = [8, 8, 4], strides = [1, 1, 1]} : vector<9x9x4xbf16> to vector<8x8x4xbf16>
    %20 = vector.shape_cast %19 : vector<8x8x4xbf16> to vector<64x4xbf16>
    %c2_23 = arith.constant 2 : index
    %c0_24 = arith.constant 0 : index
    %c0_25 = arith.constant 0 : index
    %21 = vector.load %arg4[%c2_23, %c0_24, %c0_25] : memref<9x4x8xbf16, #tpu.memory_space<vmem>>, vector<1x4x8xbf16>
    %22 = vector.shape_cast %21 : vector<1x4x8xbf16> to vector<4x8xbf16>
    %cst_26 = arith.constant dense<0.000000e+00> : vector<64x8xf32>
    %23 = tpu.matmul %20, %22, %cst_26 {dimension_numbers = #tpu.dot_dimension_numbers<[1], [0], [0], [1], [0, 0, 1, 1], [], []>} : vector<64x4xbf16>, vector<4x8xbf16>, vector<64x8xf32> -> vector<64x8xf32>
    %24 = arith.addf %18, %23 : vector<64x8xf32>
    %25 = vector.extract_strided_slice %5 {offsets = [0, 0, 0], sizes = [8, 8, 4], strides = [1, 1, 1]} : vector<9x9x4xbf16> to vector<8x8x4xbf16>
    %26 = vector.shape_cast %25 : vector<8x8x4xbf16> to vector<64x4xbf16>
    %c3_27 = arith.constant 3 : index
    %c0_28 = arith.constant 0 : index
    %c0_29 = arith.constant 0 : index
    %27 = vector.load %arg4[%c3_27, %c0_28, %c0_29] : memref<9x4x8xbf16, #tpu.memory_space<vmem>>, vector<1x4x8xbf16>
    %28 = vector.shape_cast %27 : vector<1x4x8xbf16> to vector<4x8xbf16>
    %cst_30 = arith.constant dense<0.000000e+00> : vector<64x8xf32>
    %29 = tpu.matmul %26, %28, %cst_30 {dimension_numbers = #tpu.dot_dimension_numbers<[1], [0], [0], [1], [0, 0, 1, 1], [], []>} : vector<64x4xbf16>, vector<4x8xbf16>, vector<64x8xf32> -> vector<64x8xf32>
    %30 = arith.addf %24, %29 : vector<64x8xf32>
    %31 = vector.extract_strided_slice %7 {offsets = [0, 0, 0], sizes = [8, 8, 4], strides = [1, 1, 1]} : vector<9x9x4xbf16> to vector<8x8x4xbf16>
    %32 = vector.shape_cast %31 : vector<8x8x4xbf16> to vector<64x4xbf16>
    %c4 = arith.constant 4 : index
    %c0_31 = arith.constant 0 : index
    %c0_32 = arith.constant 0 : index
    %33 = vector.load %arg4[%c4, %c0_31, %c0_32] : memref<9x4x8xbf16, #tpu.memory_space<vmem>>, vector<1x4x8xbf16>
    %34 = vector.shape_cast %33 : vector<1x4x8xbf16> to vector<4x8xbf16>
    %cst_33 = arith.constant dense<0.000000e+00> : vector<64x8xf32>
    %35 = tpu.matmul %32, %34, %cst_33 {dimension_numbers = #tpu.dot_dimension_numbers<[1], [0], [0], [1], [0, 0, 1, 1], [], []>} : vector<64x4xbf16>, vector<4x8xbf16>, vector<64x8xf32> -> vector<64x8xf32>
    %36 = arith.addf %30, %35 : vector<64x8xf32>
    %37 = vector.extract_strided_slice %5 {offsets = [0, 1, 0], sizes = [8, 8, 4], strides = [1, 1, 1]} : vector<9x9x4xbf16> to vector<8x8x4xbf16>
    %38 = vector.shape_cast %37 : vector<8x8x4xbf16> to vector<64x4xbf16>
    %c5 = arith.constant 5 : index
    %c0_34 = arith.constant 0 : index
    %c0_35 = arith.constant 0 : index
    %39 = vector.load %arg4[%c5, %c0_34, %c0_35] : memref<9x4x8xbf16, #tpu.memory_space<vmem>>, vector<1x4x8xbf16>
    %40 = vector.shape_cast %39 : vector<1x4x8xbf16> to vector<4x8xbf16>
    %cst_36 = arith.constant dense<0.000000e+00> : vector<64x8xf32>
    %41 = tpu.matmul %38, %40, %cst_36 {dimension_numbers = #tpu.dot_dimension_numbers<[1], [0], [0], [1], [0, 0, 1, 1], [], []>} : vector<64x4xbf16>, vector<4x8xbf16>, vector<64x8xf32> -> vector<64x8xf32>
    %42 = arith.addf %36, %41 : vector<64x8xf32>
    %43 = vector.extract_strided_slice %1 {offsets = [1, 0, 0], sizes = [8, 8, 4], strides = [1, 1, 1]} : vector<9x9x4xbf16> to vector<8x8x4xbf16>
    %44 = vector.shape_cast %43 : vector<8x8x4xbf16> to vector<64x4xbf16>
    %c6 = arith.constant 6 : index
    %c0_37 = arith.constant 0 : index
    %c0_38 = arith.constant 0 : index
    %45 = vector.load %arg4[%c6, %c0_37, %c0_38] : memref<9x4x8xbf16, #tpu.memory_space<vmem>>, vector<1x4x8xbf16>
    %46 = vector.shape_cast %45 : vector<1x4x8xbf16> to vector<4x8xbf16>
    %cst_39 = arith.constant dense<0.000000e+00> : vector<64x8xf32>
    %47 = tpu.matmul %44, %46, %cst_39 {dimension_numbers = #tpu.dot_dimension_numbers<[1], [0], [0], [1], [0, 0, 1, 1], [], []>} : vector<64x4xbf16>, vector<4x8xbf16>, vector<64x8xf32> -> vector<64x8xf32>
    %48 = arith.addf %42, %47 : vector<64x8xf32>
    %49 = vector.extract_strided_slice %3 {offsets = [1, 0, 0], sizes = [8, 8, 4], strides = [1, 1, 1]} : vector<9x9x4xbf16> to vector<8x8x4xbf16>
    %50 = vector.shape_cast %49 : vector<8x8x4xbf16> to vector<64x4xbf16>
    %c7 = arith.constant 7 : index
    %c0_40 = arith.constant 0 : index
    %c0_41 = arith.constant 0 : index
    %51 = vector.load %arg4[%c7, %c0_40, %c0_41] : memref<9x4x8xbf16, #tpu.memory_space<vmem>>, vector<1x4x8xbf16>
    %52 = vector.shape_cast %51 : vector<1x4x8xbf16> to vector<4x8xbf16>
    %cst_42 = arith.constant dense<0.000000e+00> : vector<64x8xf32>
    %53 = tpu.matmul %50, %52, %cst_42 {dimension_numbers = #tpu.dot_dimension_numbers<[1], [0], [0], [1], [0, 0, 1, 1], [], []>} : vector<64x4xbf16>, vector<4x8xbf16>, vector<64x8xf32> -> vector<64x8xf32>
    %54 = arith.addf %48, %53 : vector<64x8xf32>
    %55 = vector.extract_strided_slice %1 {offsets = [1, 1, 0], sizes = [8, 8, 4], strides = [1, 1, 1]} : vector<9x9x4xbf16> to vector<8x8x4xbf16>
    %56 = vector.shape_cast %55 : vector<8x8x4xbf16> to vector<64x4xbf16>
    %c8 = arith.constant 8 : index
    %c0_43 = arith.constant 0 : index
    %c0_44 = arith.constant 0 : index
    %57 = vector.load %arg4[%c8, %c0_43, %c0_44] : memref<9x4x8xbf16, #tpu.memory_space<vmem>>, vector<1x4x8xbf16>
    %58 = vector.shape_cast %57 : vector<1x4x8xbf16> to vector<4x8xbf16>
    %cst_45 = arith.constant dense<0.000000e+00> : vector<64x8xf32>
    %59 = tpu.matmul %56, %58, %cst_45 {dimension_numbers = #tpu.dot_dimension_numbers<[1], [0], [0], [1], [0, 0, 1, 1], [], []>} : vector<64x4xbf16>, vector<4x8xbf16>, vector<64x8xf32> -> vector<64x8xf32>
    %60 = arith.addf %54, %59 : vector<64x8xf32>
    %61 = arith.truncf %60 : vector<64x8xf32> to vector<64x8xbf16>
    %c0_46 = arith.constant 0 : index
    %c0_47 = arith.constant 0 : index
    %c0_48 = arith.constant 0 : index
    %62 = vector.load %arg6[%c0_46, %c0_47, %c0_48] : memref<1x64x8xbf16, #tpu.memory_space<vmem>>, vector<1x64x8xbf16>
    %63 = vector.shape_cast %62 : vector<1x64x8xbf16> to vector<64x8xbf16>
    %64 = vector.shape_cast %61 : vector<64x8xbf16> to vector<1x64x8xbf16>
    tpu.vector_store %arg6[%c0_46, %c0_47, %c0_48], %64 {strides = array<i32>} : memref<1x64x8xbf16, #tpu.memory_space<vmem>>, vector<1x64x8xbf16>,
    %cst_49 = arith.constant dense<0.000000e+00> : vector<8xf32>
    %65 = vector.multi_reduction <add>, %60, %cst_49 [0] : vector<64x8xf32> to vector<8xf32>
    %66 = vector.shape_cast %65 : vector<8xf32> to vector<1x8xf32>
    %67 = arith.mulf %60, %60 : vector<64x8xf32>
    %cst_50 = arith.constant dense<0.000000e+00> : vector<8xf32>
    %68 = vector.multi_reduction <add>, %67, %cst_50 [0] : vector<64x8xf32> to vector<8xf32>
    %69 = vector.shape_cast %68 : vector<8xf32> to vector<1x8xf32>
    %c0_51 = arith.constant 0 : index
    %c0_52 = arith.constant 0 : index
    %c0_53 = arith.constant 0 : index
    %70 = vector.load %arg3[%c0_51, %c0_52, %c0_53] : memref<1x64x4xf32, #tpu.memory_space<vmem>>, vector<1x64x4xf32>
    %71 = vector.shape_cast %70 : vector<1x64x4xf32> to vector<64x4xf32>
    %c0_54 = arith.constant 0 : index
    %c0_55 = arith.constant 0 : index
    %72 = vector.load %arg5[%c0_54, %c0_55] : memref<4x8xf32, #tpu.memory_space<vmem>>, vector<4x8xf32>
    %cst_56 = arith.constant dense<0.000000e+00> : vector<64x8xf32>
    %73 = tpu.matmul %71, %72, %cst_56 {dimension_numbers = #tpu.dot_dimension_numbers<[1], [0], [0], [1], [0, 0, 1, 1], [], []>} : vector<64x4xf32>, vector<4x8xf32>, vector<64x8xf32> -> vector<64x8xf32>
    %c0_57 = arith.constant 0 : index
    %c0_58 = arith.constant 0 : index
    %c0_59 = arith.constant 0 : index
    %74 = vector.load %arg7[%c0_57, %c0_58, %c0_59] : memref<1x64x8xf32, #tpu.memory_space<vmem>>, vector<1x64x8xf32>
    %75 = vector.shape_cast %74 : vector<1x64x8xf32> to vector<64x8xf32>
    %76 = vector.shape_cast %73 : vector<64x8xf32> to vector<1x64x8xf32>
    tpu.vector_store %arg7[%c0_57, %c0_58, %c0_59], %76 {strides = array<i32>} : memref<1x64x8xf32, #tpu.memory_space<vmem>>, vector<1x64x8xf32>,
    %cst_60 = arith.constant dense<0.000000e+00> : vector<8xf32>
    %77 = vector.multi_reduction <add>, %73, %cst_60 [0] : vector<64x8xf32> to vector<8xf32>
    %78 = vector.shape_cast %77 : vector<8xf32> to vector<1x8xf32>
    %79 = arith.mulf %73, %73 : vector<64x8xf32>
    %cst_61 = arith.constant dense<0.000000e+00> : vector<8xf32>
    %80 = vector.multi_reduction <add>, %79, %cst_61 [0] : vector<64x8xf32> to vector<8xf32>
    %81 = vector.shape_cast %80 : vector<8xf32> to vector<1x8xf32>
    %82 = tpu.concatenate %66, %69, %78, %81 in 0 : vector<1x8xf32>, vector<1x8xf32>, vector<1x8xf32>, vector<1x8xf32> -> vector<4x8xf32>
    %c0_62 = arith.constant 0 : index
    %c0_63 = arith.constant 0 : index
    %c0_64 = arith.constant 0 : index
    %83 = vector.load %arg8[%c0_62, %c0_63, %c0_64] : memref<1x4x8xf32, #tpu.memory_space<vmem>>, vector<1x4x8xf32>
    %84 = vector.shape_cast %83 : vector<1x4x8xf32> to vector<4x8xf32>
    %85 = vector.shape_cast %82 : vector<4x8xf32> to vector<1x4x8xf32>
    tpu.vector_store %arg8[%c0_62, %c0_63, %c0_64], %85 {strides = array<i32>} : memref<1x4x8xf32, #tpu.memory_space<vmem>>, vector<1x4x8xf32>,
    return
  }
  func.func @transform_0(%arg0: i32, %arg1: i32) -> (i32, i32, i32, i32, i32) {
    %c0_i32 = arith.constant 0 : i32
    %c0_i32_0 = arith.constant 0 : i32
    %c0_i32_1 = arith.constant 0 : i32
    %c0_i32_2 = arith.constant 0 : i32
    %c0_i32_3 = arith.constant 0 : i32
    return %arg0, %c0_i32, %c0_i32_0, %c0_i32_1, %c0_i32_2 : i32, i32, i32, i32, i32
  }
  func.func @transform_1(%arg0: i32, %arg1: i32) -> (i32, i32, i32) {
    %c0_i32 = arith.constant 0 : i32
    %c0_i32_0 = arith.constant 0 : i32
    %c0_i32_1 = arith.constant 0 : i32
    return %arg0, %c0_i32, %c0_i32_0 : i32, i32, i32
  }
  func.func @transform_2(%arg0: i32, %arg1: i32) -> (i32, i32, i32) {
    %c0_i32 = arith.constant 0 : i32
    %c0_i32_0 = arith.constant 0 : i32
    %c0_i32_1 = arith.constant 0 : i32
    return %c0_i32, %c0_i32_0, %arg1 : i32, i32, i32
  }
  func.func @transform_3(%arg0: i32, %arg1: i32) -> (i32, i32) {
    %c0_i32 = arith.constant 0 : i32
    %c0_i32_0 = arith.constant 0 : i32
    return %c0_i32, %arg1 : i32, i32
  }
  func.func @transform_4(%arg0: i32, %arg1: i32) -> (i32, i32, i32) {
    %c0_i32 = arith.constant 0 : i32
    %c0_i32_0 = arith.constant 0 : i32
    return %arg0, %c0_i32, %arg1 : i32, i32, i32
  }
  func.func @transform_5(%arg0: i32, %arg1: i32) -> (i32, i32, i32) {
    %c0_i32 = arith.constant 0 : i32
    %c0_i32_0 = arith.constant 0 : i32
    return %arg0, %c0_i32, %arg1 : i32, i32, i32
  }
  func.func @transform_6(%arg0: i32, %arg1: i32) -> (i32, i32, i32) {
    %c0_i32 = arith.constant 0 : i32
    %c0_i32_0 = arith.constant 0 : i32
    return %arg0, %c0_i32, %arg1 : i32, i32, i32
  }
}

</mosaic_0001>

<bundles_post_ra>
// kernel: tpu_custom_call.1
= control target key start
LH: loop header
LB: loop body
LE: loop exit
PB: predicated region body
PF: predicated region fallthrough
CT: control target
= control target key end

     0   :  { %12 = vsyncpa [#allocation3], 0  ;;  %s3252_s0 = inlined_call_operand.vmem [shape: bf16[2,4,9,9,4], index: 0, kind: input, shape index: {}]   ;;  %s3253_s1 = inlined_call_operand.vmem [shape: f32[2,64,4], index: 1, kind: input, shape index: {}]   ;;  %s3254_s2 = inlined_call_operand.vmem [shape: bf16[9,4,8], index: 2, kind: input, shape index: {}]   ;;  %s3255_s3 = inlined_call_operand.vmem [shape: f32[4,8], index: 3, kind: input, shape index: {}]   ;;  %s3256_s4 = inlined_call_operand.vmem [shape: bf16[2,64,8], index: 4, kind: output, shape index: {0}]   ;;  %s3257_s5 = inlined_call_operand.vmem [shape: f32[2,64,8], index: 5, kind: output, shape index: {1}]   ;;  %s3258_s6 = inlined_call_operand.hbm [shape: f32[2,4,8], index: 6, kind: output, shape index: {2}]  }
   0x1   :  { %14 = vsyncpa [#allocation3 + $0x1], 0  ;;  %s2675_s21 = smov 0   ;;  %s2677_s22 = smov 0  }
   0x2   :  { %s2679_s23 = smov 0   ;;  %s2681_s24 = smov 0  }
   0x3   :  { %s2683_s25 = smov 0   ;;  %s2685_s26 = smov 0  }
   0x4 LB: > { %s2088_s27 = sadd.s32 4294967295, %s2637_s26   ;;  %s2089_s28 = sadd.s32 4294967294, %s2637_s26   ;;  %s2637_s26 = sphi %s2685_s26, %s20_s26   ;;  %s2633_s25 = sphi %s2683_s25, %s3267_s25   ;;  %s2629_s24 = sphi %s2681_s24, %s3266_s24   ;;  %s2625_s23 = sphi %s2679_s23, %s3265_s23   ;;  %s2621_s22 = sphi %s2677_s22, %s3264_s22   ;;  %s2617_s21 = sphi %s2675_s21, %s3263_s21  }
   0x5   : > { %s32_s29 = sadd.s32 1, %s2633_s25  ;;  %s201_s30 = sadd.s32 1, %s2625_s23 }
   0x6   : > { %p34_p0 = scmp.ge.s32.totalorder %s32_s29, 2  ;;  %p211_p1 = scmp.ne.s32.totalorder %s2625_s23, %s2621_s22 }
   0x7   : > { %p212_p2 = scmp.eq.s32.totalorder %s2088_s27, 1  ;;  %p217_p3 = scmp.ne.s32.totalorder %s2621_s22, %s2617_s21 }
   0x8   : > { %s3269_s29 = smov (%p34_p0, %s32_s29), 0  ;;  %p218_p5 = scmp.eq.s32.totalorder %s2089_s28, 1 }
   0x9   : > { %p2715_p4 = por %p212_p2, %p211_p1  ;;  %s196_s8 = ssub.s32 %s2633_s25, %s3269_s29 }
   0xa   : > { %p2094_p6 = scmp.ge.s32.totalorder %s2637_s26, 1  ;;  %p199_p7 = scmp.eq.s32.totalorder %s196_s8, 0 }
   0xb   : > { %p2722_p8 = por %p218_p5, %p217_p3  ;;  %p266_p9 = scmp.lt.s32.totalorder %s2637_s26, 3 }
   0xc   : > { %s2728_s10 = scalar_select %p199_p7, %s2625_s23, %s201_s30  }
   0xd   : > { %p267_p10 = pnand %p2094_p6, %p266_p9 }
   0xe   : > { %vm450_vm0 = vcmask (!%p267_p10), 1041408   ;;  %v2171_v0 = vld [vmem:[%s3254_s2 + $0x8] sm:$0x3] (!%p267_p10)  ;;  %v2136_v1 = vld [vmem:[%s3254_s2 + $0x2] sm:$0x3] (!%p267_p10)  ;;  %p325_p11 = scmp.lt.s32.totalorder (!%p267_p10), %s2629_s24, 1 }
   0xf   : > { %270 = sbr.rel (%p267_p10) target bundleno = 370 (0x172), region = 36  ;;  %2474 = vmatprep.subr.msk.bf16.mxu0 (!%p267_p10), %vm450_vm0, %v2171_v0  ;;  %2470 = vmatprep.subr.msk.bf16.mxu1 (!%p267_p10), %vm450_vm0, %v2136_v1  ;;  %v981_v2 = vsel (!%p267_p10), %vm450_vm0, %v2171_v0, 0  ;;  %v452_v3 = vsel (!%p267_p10), %vm450_vm0, %v2136_v1, 0  ;;  %v2180_v4 = vld [vmem:[%s3254_s2 + $0xa] sm:$0x3] (!%p267_p10)  ;;  %vm437_vm1 = vcmask (!%p267_p10), 31744  }
  0x10   : > { %2343 = vmatpush3.bf16.msra.mxu0 (!%p267_p10), %v981_v2  ;;  %2303 = vmatpush3.bf16.msra.mxu1 (!%p267_p10), %v452_v3  ;;  %v414_v5 = vld [vmem:[%s3254_s2] sm:$0x3] (!%p267_p10)  ;;  %v1195_v6 = vsel (!%p267_p10), %vm450_vm0, %v2180_v4, 0  ;;  %v2189_v14 = vld [vmem:[%s3254_s2 + $0xc] sm:$0x3] (!%p267_p10)  ;;  %vm1696_vm5 = vcmask (!%p267_p10), 1043456  }
  0x11   : > { %2475 = vmatprep.subr.msk.bf16.mxu0 (!%p267_p10), %vm450_vm0, %v2180_v4  ;;  %2471 = vmatprep.subr.msk.bf16.mxu1 (!%p267_p10), %vm450_vm0, %v414_v5  ;;  %v552_v7 = vsel (!%p267_p10), %vm450_vm0, %v414_v5, 0  ;;  %v2153_v15 = vld [vmem:[%s3254_s2 + $0x4] sm:$0x3] (!%p267_p10)  ;;  %vm619_vm2 = vsmask.f32 (!%p267_p10), 3328  ;;  %v2808_v26 = vsel (!%p267_p10), %vm450_vm0, %v2189_v14, 0 }
  0x12   : > { %vm620_vm3 = vsmask.f32 (!%p267_p10), 7440  ;;  %v2791_v20 = vld [vmem:[%s3254_s2 + $0x6] sm:$0x3] (!%p267_p10)  ;;  %v2811_v27 = vsel (!%p267_p10), %vm450_vm0, %v2153_v15, 0  ;;  %vm1612_vm6 = vcmask (!%p267_p10), 64512  }
  0x13   : > { %v2833_v38 = vsel (!%p267_p10), %vm450_vm0, %v2791_v20, 0  ;;  %vm2868_vm4 = vmor (!%p267_p10), %vm619_vm2, %vm620_vm3  ;;  %vm1603_vm7 = vcmask (!%p267_p10), 60416   ;;  %vm1863_vm8 = vcmask (!%p267_p10), 1040384   ;;  %s2234_s28 = sshll.u32 (!%p267_p10), %s2629_s24, 6  ;;  %vm1866_vm9 = vcmask (!%p267_p10), 1042432  }
  0x16   : > { %s2745_s17 = scalar_select %p325_p11, %s2629_s24, 1 }
  0x18   : > { %s2479_s20 = smul.u32 288, %s2745_s17  ;;  %s2237_s8 = sshll.u32 %s2745_s17, 6 }
  0x19   : > { %s334_s13 = scalar_lea.vmem %s3253_s1, %s2237_s8  ;;  %s3118_s15 = scalar_lea.vmem %s3257_s5, %s2237_s8 }
  0x1a   : > { %s2756_s30 = scalar_lea.vmem %s3252_s0, %s2479_s20  ;;  %s2238_s16 = sshll.u32 %s2745_s17, 5 }
  0x1b   : > { %v2103_v8 = vld [vmem:[%s2756_s30 + $0x48] sm:$0xf]  ;;  %v2762_v9 = vld [vmem:[%s2756_s30 + $0x50] sm:$0xf]  ;;  %v2765_v10 = vld [vmem:[%s2756_s30 + $0x58] sm:$0xf]  ;;  %s3126_s20 = scalar_lea.vmem %s3256_s4, %s2238_s16 }
  0x1c   : > { %v2768_v11 = vld [vmem:[%s2756_s30 + $0x60] sm:$0xf]  ;;  %v2771_v12 = vld [vmem:[%s2756_s30 + $0x68] sm:$0xf]  ;;  %v2137_v13 = vcombine.low %v2103_v8, %v2762_v9  ;;  %v2786_v19 = vld [vmem:[%s2756_s30 + $0x70] sm:$0xf] }
  0x1d   : > { %v2138_v16 = vcombine.low %v2765_v10, %v2768_v11  ;;  %v2539_v17 = vld [vmem:[%s2756_s30 + $0xd8] ss:$8 sps:$4 sm:$0xff]   ;;  %v2540_v18 = vld [vmem:[%s2756_s30 + $0xe8] ss:$8 sps:$4 sm:$0xff]   ;;  %v2139_v21 = vcombine.low %v2771_v12, %v2786_v19  ;;  %v2113_v36 = vld [vmem:[%s2756_s30 + $0x94] sm:$0x1] }
  0x1e   : > { %2304 = vmatprep.mubr.msk.bf16.mxu1 %vm437_vm1, %v2137_v13  ;;  %2344 = vmatprep.mubr.msk.bf16.mxu0 %vm437_vm1, %v2539_v17  ;;  %v2542_v22 = vld [vmem:[%s2756_s30 + $0xf8] ss:$8 sps:$4 sm:$0xff]   ;;  %v2544_v28 = vld [vmem:[%s2756_s30 + $0x108] ss:$8 sps:$4 sm:$0xff]   ;;  %v2115_v41 = vld [vmem:[%s2756_s30 + $0x9c] sm:$0x1] }
  0x1f   : > { %2305 = vmatmul.mubr.msk.bf16.vlgmr.msra.gmra.mrb[0].mxu1 %vm437_vm1, %v2138_v16  ;;  %2345 = vmatmul.mubr.msk.bf16.vlgmr.msra.gmra.mrb[0].mxu0 %vm437_vm1, %v2540_v18  ;;  %v2800_v23 = vld [vmem:[%s2756_s30 + $0x78] sm:$0xf]  ;;  %v2803_v24 = vld [vmem:[%s2756_s30 + $0x80] sm:$0xf]  ;;  %v2816_v29 = vld [vmem:[%s2756_s30 + $0x8] sm:$0xf] }
  0x20   : > { %2313 = vmatpush3.bf16.msra.mxu1 %v552_v7  ;;  %2353 = vmatpush3.bf16.msra.mxu0 %v1195_v6  ;;  %v360_v25 = vld [vmem:[%s2756_s30] sm:$0xf]  ;;  %v2819_v32 = vld [vmem:[%s2756_s30 + $0x90] sm:$0xf]  ;;  %v2140_v33 = vcombine.low %v2800_v23, %v2803_v24  ;;  %v637_v35 = vshrl.u32 %v2816_v29, 16  ;;  %v640_v40 = vshll.u32 %v2816_v29, 16  ;;  %v2201_v1 = vcombine.low %v2786_v19, %v2800_v23 }
  0x21   : > { %2308 = vmatprep.mubr.msk.bf16.mxu1 %vm437_vm1, %v2139_v21  ;;  %2348 = vmatprep.mubr.msk.bf16.mxu0 %vm437_vm1, %v2542_v22  ;;  %v623_v30 = vshrl.u32 %v360_v25, 16  ;;  %v626_v31 = vshll.u32 %v360_v25, 16  ;;  %v2145_v34 = vcombine.low %v360_v25, %v2816_v29  ;;  %v2828_v37 = vld [vmem:[%s2756_s30 + $0x98] sm:$0xf]  ;;  %v1057_v42 = vshrl.u32 %v2819_v32, 16  ;;  %s322_s17 = sand.u32 1, %s2621_s22  }
  0x22   : > { %2476 = vmatprep.subr.msk.bf16.mxu0 %vm450_vm0, %v2189_v14  ;;  %2472 = vmatprep.subr.msk.bf16.mxu1 %vm450_vm0, %v2153_v15  ;;  %v1060_v43 = vshll.u32 %v2819_v32, 16  ;;  %v1066_v44 = vshll.u32 %v2113_v36, 16  ;;  %v1071_v45 = vshrl.u32 %v2828_v37, 16  ;;  %v1074_v46 = vshll.u32 %v2828_v37, 16  ;;  %v2844_v48 = vld [vmem:[%s2756_s30 + $0x10] sm:$0xf] }
  0x23   : > { %v2835_v39 = vrot.slane %v623_v30, 4  ;;  %v1080_v47 = vshll.u32 %v2115_v41, 16  ;;  %v2846_v49 = vrot.slane %v626_v31, 5  ;;  %v1059_v50 = vrot.slane %v1057_v42, 4  ;;  %v2849_v52 = vld [vmem:[%s2756_s30 + $0x18] sm:$0xf] }
  0x24   : > { %v1062_v51 = vrot.slane %v1060_v43, 5  ;;  %v651_v53 = vshrl.u32 %v2844_v48, 16  ;;  %v1068_v54 = vrot.slane %v1066_v44, 5  ;;  %v1073_v55 = vrot.slane %v1071_v45, 4  ;;  %v2855_v58 = vld [vmem:[%s2756_s30 + $0xa0] sm:$0xf] }
  0x25   : > { %v1076_v56 = vrot.slane %v1074_v46, 5  ;;  %v654_v57 = vshll.u32 %v2844_v48, 16  ;;  %v1082_v60 = vrot.slane %v1080_v47, 5  ;;  %v2146_v61 = vcombine.low %v2844_v48, %v2849_v52  ;;  %v2117_v63 = vld [vmem:[%s2756_s30 + $0xa4] sm:$0x1]  ;;  %s2095_s27 = sshll.u32 %s322_s17, 2 }
  0x26   : > { %v1063_v59 = vor.u32 %v1062_v51, %v1059_v50  ;;  %v665_v62 = vshrl.u32 %v2849_v52, 16  ;;  %v2864_v0 = vld [vmem:[%s2756_s30 + $0xa8] sm:$0xf]  ;;  %v2119_v3 = vld [vmem:[%s2756_s30 + $0xac] sm:$0x1]  ;;  %v1085_v4 = vshrl.u32 %v2855_v58, 16 }
  0x27   : > { %2309 = vmatmul.mubr.msk.bf16.gmra.mrb[4].mxu1 %vm437_vm1, %v2140_v33  ;;  %2349 = vmatmul.mubr.msk.bf16.gmra.mrb[4].mxu0 %vm437_vm1, %v2544_v28  ;;  %v1077_v2 = vor.u32 %v1076_v56, %v1073_v55  ;;  %v1088_v5 = vshll.u32 %v2855_v58, 16  ;;  %v1094_v6 = vshll.u32 %v2117_v63, 16  ;;  %v1099_v8 = vshrl.u32 %v2864_v0, 16  ;;  %v2878_v15 = vld [vmem:[%s2756_s30 + $0x20] sm:$0xf]  ;;  %s324_s8 = scalar_lea.vmem [#allocation2], %s2095_s27 }
  0x28   : > { %2314 = vmatprep.mubr.msk.bf16.mxu1 %vm437_vm1, %v2145_v34  ;;  %v1064_v7 = vrot.slane %v1063_v59, 4  ;;  %v1102_v13 = vshll.u32 %v2864_v0, 16  ;;  %v1108_v14 = vshll.u32 %v2119_v3, 16  ;;  %v668_v17 = vshll.u32 %v2849_v52, 16  ;;  %v2882_v22 = vld [vmem:[%s2756_s30 + $0x28] sm:$0xf] }
  0x29   : > { %v1078_v16 = vrot.slane %v1077_v2, 4  ;;  %v1087_v18 = vrot.slane %v1085_v4, 4  ;;  %v1090_v21 = vrot.slane %v1088_v5, 5  ;;  %v1096_v28 = vrot.slane %v1094_v6, 5  ;;  %v2887_v33 = vld [vmem:[%s2756_s30 + $0xb0] sm:$0xf] }
  0x2a   : > { %v1069_v25 = vsel %vm2868_vm4, %v1064_v7, %v1068_v54  ;;  %v1101_v30 = vrot.slane %v1099_v8, 4  ;;  %v1104_v31 = vrot.slane %v1102_v13, 5  ;;  %v1110_v41 = vrot.slane %v1108_v14, 5  ;;  %v2121_v43 = vld [vmem:[%s2756_s30 + $0xb4] sm:$0x1]  ;;  %s1906_s11 = sshll.u32 %s324_s8, 4  ;;  %s3204_s11 = int_to_ptr.vmem [resolvable:$true] %s1906_s11 }
  0x2b   : > { %v1083_v34 = vsel %vm2868_vm4, %v1078_v16, %v1082_v60  ;;  %v1091_v36 = vor.u32 %v1090_v21, %v1087_v18  ;;  %v2147_v42 = vcombine.low %v2878_v15, %v2882_v22  ;;  %v2895_v44 = vld [vmem:[%s2756_s30 + $0xb8] sm:$0xf]  ;;  %v679_v47 = vshrl.u32 %v2878_v15, 16  ;;  %v2123_v51 = vld [vmem:[%s2756_s30 + $0xbc] sm:$0x1]  ;;  %s1886_s24 = scalar_lea.sflag [#allocation3], %s322_s17 }
  0x2c   : > { %v2181_v45 = vcombine.low %v1069_v25, %v1083_v34  ;;  %v1105_v46 = vor.u32 %v1104_v31, %v1101_v30  ;;  %v682_v50 = vshll.u32 %v2878_v15, 16  ;;  %v693_v55 = vshrl.u32 %v2882_v22, 16  ;;  %v2905_v60 = vld [vmem:[%s2756_s30 + $0x30] sm:$0xf]  ;;  %v2912_v4 = vld [vmem:[%s2756_s30 + $0x38] sm:$0xf] }
  0x2d   : > { %v1092_v54 = vrot.slane %v1091_v36, 4  ;;  %v696_v56 = vshll.u32 %v2882_v22, 16  ;;  %v1113_v59 = vshrl.u32 %v2887_v33, 16  ;;  %v1116_v2 = vshll.u32 %v2887_v33, 16  ;;  %v2925_v18 = vld [vmem:[%s2756_s30 + $0xc0] sm:$0xf] }
  0x2e   : > { %2354 = vmatprep.mubr.msk.bf16.mxu0 %vm437_vm1, %v2181_v45  ;;  %v1106_v63 = vrot.slane %v1105_v46, 4  ;;  %v1122_v3 = vshll.u32 %v2121_v43, 16  ;;  %v1130_v7 = vshll.u32 %v2895_v44, 16  ;;  %v1136_v8 = vshll.u32 %v2123_v51, 16  ;;  %v2930_v21 = vld [vmem:[%s3254_s2 + $0xe] sm:$0x3] }
  0x2f   : > { %2315 = vmatmul.mubr.msk.bf16.vlgmr.msra.gmra.mrb[0].mxu1 %vm437_vm1, %v2146_v61  ;;  %v1127_v61 = vshrl.u32 %v2895_v44, 16  ;;  %v1097_v5 = vsel %vm2868_vm4, %v1092_v54, %v1096_v28  ;;  %v1115_v6 = vrot.slane %v1113_v59, 4  ;;  %v2191_v13 = vcombine.low %v2849_v52, %v2878_v15  ;;  %v2125_v31 = vld [vmem:[%s2756_s30 + $0xc4] sm:$0x1]  ;;  %v2936_v34 = vld [vmem:[%s2756_s30 + $0xc8] sm:$0xf] }
  0x30   : > { %2323 = vmatpush3.bf16.msra.mxu1 %v2811_v27  ;;  %2318 = vmatprep.mubr.msk.bf16.mxu1 %vm437_vm1, %v2147_v42  ;;  %v1111_v27 = vsel %vm2868_vm4, %v1106_v63, %v1110_v41  ;;  %v1118_v14 = vrot.slane %v1116_v2, 5  ;;  %v1124_v28 = vrot.slane %v1122_v3, 5  ;;  %v1132_v30 = vrot.slane %v1130_v7, 5  ;;  %v2127_v45 = vld [vmem:[%s2756_s30 + $0xcc] sm:$0x1]  ;;  %s2559_s14 = scalar_lea.vmem %s3204_s11, 64 }
  0x31   : > { %2473 = vmatprep.subr.msk.bf16.mxu1 %vm450_vm0, %v2791_v20  ;;  %v1129_v16 = vrot.slane %v1127_v61, 4  ;;  %v2182_v25 = vcombine.low %v1097_v5, %v1111_v27  ;;  %v2148_v20 = vcombine.low %v2905_v60, %v2912_v4  ;;  %v1138_v41 = vrot.slane %v1136_v8, 5  ;;  %v361_v27 = vld [vmem:[%s2756_s30 + $0x4] sm:$0x1]  ;;  %p2560_p12 = scmp.ne.s32.totalorder %s3204_s11, %s2559_s14 }
  0x32   : > { %v1119_v36 = vor.u32 %v1118_v14, %v1115_v6  ;;  %v707_v42 = vshrl.u32 %v2905_v60, 16  ;;  %v710_v43 = vshll.u32 %v2905_v60, 16  ;;  %v721_v51 = vshrl.u32 %v2912_v4, 16 }
  0x33   : > { %2355 = vmatmul.mubr.msk.bf16.vlgmr.msra.gmra.mrb[0].mxu0 %vm437_vm1, %v2182_v25  ;;  %v1133_v46 = vor.u32 %v1132_v30, %v1129_v16  ;;  %v1141_v54 = vshrl.u32 %v2925_v18, 16  ;;  %v1144_v59 = vshll.u32 %v2925_v18, 16  ;;  %v1150_v2 = vshll.u32 %v2125_v31, 16  ;;  %v363_v30 = vld [vmem:[%s2756_s30 + $0xc] sm:$0x1]  ;;  %p2561_p13 = pnand %p2560_p12, %p2715_p4 }
  0x34   : > { %2363 = vmatpush3.bf16.msra.mxu0 %v2808_v26  ;;  %v1120_v63 = vrot.slane %v1119_v36, 4  ;;  %v1155_v3 = vshrl.u32 %v2936_v34, 16  ;;  %v1158_v61 = vshll.u32 %v2936_v34, 16  ;;  %v1164_v8 = vshll.u32 %v2127_v45, 16 }
  0x35   : > { %v1134_v5 = vrot.slane %v1133_v46, 4  ;;  %v1143_v6 = vrot.slane %v1141_v54, 4  ;;  %v1146_v7 = vrot.slane %v1144_v59, 5  ;;  %2477 = vmatprep.subr.msk.bf16.mxu0 %vm450_vm0, %v2930_v21  ;;  %v1152_v14 = vrot.slane %v1150_v2, 5  ;;  %p2562_p0 = pneg %p2561_p13 }
  0x36   : > { %v1125_v26 = vsel %vm2868_vm4, %v1120_v63, %v1124_v28  ;;  %v1157_v16 = vrot.slane %v1155_v3, 4  ;;  %v1160_v25 = vrot.slane %v1158_v61, 5  ;;  %v629_v45 = vor.u32 %v2846_v49, %v2835_v39 }
  0x37   : > { %2319 = vmatmul.mubr.msk.bf16.gmra.mrb[4].mxu1 %vm437_vm1, %v2148_v20  ;;  %v1139_v31 = vsel %vm2868_vm4, %v1134_v5, %v1138_v41  ;;  %v1147_v36 = vor.u32 %v1146_v7, %v1143_v6  ;;  %v1166_v20 = vrot.slane %v1164_v8, 5  ;;  %v632_v59 = vshll.u32 %v361_v27, 16  ;;  %v365_v41 = vld [vmem:[%s2756_s30 + $0x14] sm:$0x1]  ;;  %v367_v27 = vld [vmem:[%s2756_s30 + $0x1c] sm:$0x1] }
  0x38   : > { %v2183_v46 = vcombine.low %v1125_v26, %v1139_v31  ;;  %v1161_v54 = vor.u32 %v1160_v25, %v1157_v16  ;;  %v639_v28 = vrot.slane %v637_v35, 4  ;;  %v630_v2 = vrot.slane %v629_v45, 4 }
  0x39   : > { %v1148_v63 = vrot.slane %v1147_v36, 4  ;;  %v642_v3 = vrot.slane %v640_v40, 5  ;;  %v646_v61 = vshll.u32 %v363_v30, 16  ;;  %v634_v6 = vrot.slane %v632_v59, 5  ;;  %v371_v59 = vld [vmem:[%s2756_s30 + $0x2c] sm:$0x1] }
  0x3a   : > { %2358 = vmatprep.mubr.msk.bf16.mxu0 %vm437_vm1, %v2183_v46  ;;  %v1162_v5 = vrot.slane %v1161_v54, 4  ;;  %v2190_v39 = vcombine.low %v2816_v29, %v2844_v48  ;;  %v653_v49 = vrot.slane %v651_v53, 4  ;;  %v656_v40 = vrot.slane %v654_v57, 5  ;;  %v369_v53 = vld [vmem:[%s2756_s30 + $0x24] sm:$0x1] }
  0x3b   : > { %v1153_v35 = vsel %vm2868_vm4, %v1148_v63, %v1152_v14  ;;  %v643_v7 = vor.u32 %v642_v3, %v639_v28  ;;  %v648_v8 = vrot.slane %v646_v61, 5  ;;  %v635_v16 = vsel %vm2868_vm4, %v630_v2, %v634_v6  ;;  %v373_v2 = vld [vmem:[%s2756_s30 + $0x34] sm:$0x1] }
  0x3c   : > { %v1167_v26 = vsel %vm2868_vm4, %v1162_v5, %v1166_v20  ;;  %v660_v25 = vshll.u32 %v365_v41, 16  ;;  %v667_v29 = vrot.slane %v665_v62, 4  ;;  %v657_v31 = vor.u32 %v656_v40, %v653_v49 }
  0x3d   : > { %v2184_v30 = vcombine.low %v1153_v35, %v1167_v26  ;;  %v644_v14 = vrot.slane %v643_v7, 4  ;;  %v670_v36 = vrot.slane %v668_v17, 5  ;;  %v674_v57 = vshll.u32 %v367_v27, 16 }
  0x3e   : > { %v662_v48 = vrot.slane %v660_v25, 5  ;;  %v681_v20 = vrot.slane %v679_v47, 4  ;;  %v684_v45 = vrot.slane %v682_v50, 5  ;;  %v658_v46 = vrot.slane %v657_v31, 4 }
  0x3f   : > { %2359 = vmatmul.mubr.msk.bf16.gmra.mrb[4].mxu0 %vm437_vm1, %v2184_v30  ;;  %v2990_v62 = vsel %vm2868_vm4, %v644_v14, %v648_v8  ;;  %v671_v54 = vor.u32 %v670_v36, %v667_v29  ;;  %v688_v17 = vshll.u32 %v369_v53, 16  ;;  %v676_v47 = vrot.slane %v674_v57, 5  ;;  %v375_v8 = vld [vmem:[%s2756_s30 + $0x3c] sm:$0x1]  ;;  %v376_v30 = vld [vmem:[%s2756_s30 + $0x40] sm:$0xf] }
  0x40   : > { %v2154_v28 = vcombine.low %v635_v16, %v2990_v62  ;;  %2364 = vmatprep.mubr.msk.bf16.mxu0 %vm437_vm1, %v2190_v39  ;;  %v685_v63 = vor.u32 %v684_v45, %v681_v20  ;;  %v695_v50 = vrot.slane %v693_v55, 4  ;;  %v3000_v3 = vsel %vm2868_vm4, %v658_v46, %v662_v48  ;;  %v2207_v14 = vld [vmem:[%s3254_s2 + $0x10] sm:$0x3] }
  0x41   : > { %v672_v61 = vrot.slane %v671_v54, 4  ;;  %v690_v41 = vrot.slane %v688_v17, 5  ;;  %v698_v5 = vrot.slane %v696_v56, 5  ;;  %v724_v6 = vshll.u32 %v2912_v4, 16 }
  0x42   : > { %2324 = vmatprep.mubr.msk.bf16.mxu1 %vm437_vm1, %v2154_v28  ;;  %v686_v39 = vrot.slane %v685_v63, 4  ;;  %v702_v49 = vshll.u32 %v371_v59, 16  ;;  %v709_v55 = vrot.slane %v707_v42, 4  ;;  %v712_v27 = vrot.slane %v710_v43, 5  ;;  %v377_v59 = vld [vmem:[%s2756_s30 + $0x44] sm:$0x1] }
  0x43   : > { %v3010_v35 = vsel %vm2868_vm4, %v672_v61, %v676_v47  ;;  %v699_v7 = vor.u32 %v698_v5, %v695_v50  ;;  %v716_v56 = vshll.u32 %v373_v2, 16  ;;  %v2192_v16 = vcombine.low %v2882_v22, %v2905_v60  ;;  %v1669_v5 = vld [vmem:[%s334_s13 + $0x30] sm:$0xff] }
  0x44   : > { %v2155_v40 = vcombine.low %v3000_v3, %v3010_v35  ;;  %v704_v26 = vrot.slane %v702_v49, 5  ;;  %v723_v42 = vrot.slane %v721_v51, 4  ;;  %v1387_v25 = vsel %vm450_vm0, %v2930_v21, 0  ;;  %v1671_v21 = vld [vmem:[%s3255_s3] sm:$0xf] }
  0x45   : > { %v3025_v29 = vsel %vm2868_vm4, %v686_v39, %v690_v41  ;;  %v700_v53 = vrot.slane %v699_v7, 4  ;;  %v713_v43 = vor.u32 %v712_v27, %v709_v55  ;;  %v718_v22 = vrot.slane %v716_v56, 5 }
  0x46   : > { %2325 = vmatmul.mubr.msk.bf16.vlgmr.msra.gmra.mrb[0].mxu1 %vm437_vm1, %v2155_v40  ;;  %v726_v60 = vrot.slane %v724_v6, 5  ;;  %v730_v51 = vshll.u32 %v375_v8, 16  ;;  %v1463_v31 = vshrl.u32 %v376_v30, 16  ;;  %v1466_v57 = vshll.u32 %v376_v30, 16  ;;  %v1670_v6 = vld [vmem:[%s334_s13 + $0x38] sm:$0xff] }
  0x47   : > { %2365 = vmatmul.mubr.msk.bf16.vlgmr.msra.gmra.mrb[0].mxu0 %vm437_vm1, %v2191_v13  ;;  %2333 = vmatpush3.bf16.msra.mxu1 %v2833_v38  ;;  %v705_v36 = vsel %vm2868_vm4, %v700_v53, %v704_v26  ;;  %v714_v48 = vrot.slane %v713_v43, 4  ;;  %v2193_v15 = vcombine.low %v2912_v4, %v376_v30  ;;  %v1472_v28 = vshll.u32 %v377_v59, 16 }
  0x48   : > { %2373 = vmatpush3.bf16.msra.mxu0 %v1387_v25  ;;  %v2156_v20 = vcombine.low %v3025_v29, %v705_v36  ;;  %2368 = vmatprep.mubr.msk.bf16.mxu0 %vm437_vm1, %v2192_v16  ;;  %v727_v45 = vor.u32 %v726_v60, %v723_v42  ;;  %v732_v46 = vrot.slane %v730_v51, 5  ;;  %v1465_v54 = vrot.slane %v1463_v31, 4 }
  0x49   : > { %v1468_v17 = vrot.slane %v1466_v57, 5  ;;  %2478 = vmatprep.subr.msk.bf16.mxu0 %vm450_vm0, %v2207_v14  ;;  %2392 = vmatprep.subr.msk.mxu1 %vm1696_vm5, %v1671_v21  ;;  %v719_v38 = vsel %vm2868_vm4, %v714_v48, %v718_v22  ;;  %v2199_v47 = vcombine.low %v2762_v9, %v2765_v10  ;;  %v2163_v50 = vcombine.low %v2819_v32, %v2828_v37 }
  0x4a   : > { %2328 = vmatprep.mubr.msk.bf16.mxu1 %vm437_vm1, %v2156_v20  ;;  %v728_v52 = vrot.slane %v727_v45, 4  ;;  %v1474_v41 = vrot.slane %v1472_v28, 5  ;;  %v2200_v9 = vcombine.low %v2768_v11, %v2771_v12  ;;  %v2164_v10 = vcombine.low %v2855_v58, %v2864_v0  ;;  %v2111_v11 = vld [vmem:[%s2756_s30 + $0x88] sm:$0xf]  ;;  %v1663_v58 = vld [vmem:[%s334_s13] sm:$0xff]  ;;  %s3202_s30 = scalar_lea.hbm %s3258_s6, %s2234_s28 }
  0x4b   : > { %v1469_v13 = vor.u32 %v1468_v17, %v1465_v54  ;;  %v1496_v32 = vsel %vm450_vm0, %v2207_v14, 0  ;;  %v2165_v37 = vcombine.low %v2887_v33, %v2895_v44  ;;  %v2166_v12 = vcombine.low %v2925_v18, %v2936_v34  ;;  %v1664_v33 = vld [vmem:[%s334_s13 + $0x8] sm:$0xff]  ;;  %v1665_v18 = vld [vmem:[%s334_s13 + $0x10] sm:$0xff]  ;;  %v1667_v34 = vld [vmem:[%s334_s13 + $0x20] sm:$0xff] }
  0x4c   : > { %v733_v63 = vsel %vm2868_vm4, %v728_v52, %v732_v46  ;;  %v2202_v19 = vcombine.low %v2803_v24, %v2111_v11  ;;  %v2208_v23 = vcombine.low %v2990_v62, %v3000_v3  ;;  %v2209_v0 = vcombine.low %v3010_v35, %v3025_v29  ;;  %v1666_v24 = vld [vmem:[%s334_s13 + $0x18] sm:$0xff]  ;;  %v1668_v3 = vld [vmem:[%s334_s13 + $0x28] sm:$0xff] }
  0x4d   : > { %v2157_v2 = vcombine.low %v719_v38, %v733_v63  ;;  %v1470_v61 = vrot.slane %v1469_v13, 4  ;;  %v2210_v44 = vcombine.low %v705_v36, %v719_v38 }
  0x4f   : > { %2329 = vmatmul.mubr.msk.bf16.gmra.mrb[4].mxu1 %vm437_vm1, %v2157_v2  ;;  %2369 = vmatmul.mubr.msk.bf16.gmra.mrb[4].mxu0 %vm437_vm1, %v2193_v15  ;;  %v1475_v4 = vsel %vm2868_vm4, %v1470_v61, %v1474_v41 }
  0x50   : > { %2334 = vmatprep.mubr.msk.bf16.mxu1 %vm437_vm1, %v2163_v50  ;;  %2374 = vmatprep.mubr.msk.bf16.mxu0 %vm437_vm1, %v2199_v47  ;;  %v2211_v62 = vcombine.low %v733_v63, %v1475_v4 }
  0x57   : > { %2335 = vmatmul.mubr.msk.bf16.vlgmr.msra.gmra.mrb[0].mxu1 %vm437_vm1, %v2164_v10  ;;  %2375 = vmatmul.mubr.msk.bf16.vlgmr.msra.gmra.mrb[0].mxu0 %vm437_vm1, %v2200_v9 }
  0x58   : > { %2383 = vmatpush3.bf16.msra.mxu0 %v1496_v32  ;;  %2393 = vmatpush3.msk.msra.mxu1 %vm1696_vm5, %v1671_v21 }
  0x59   : > { %2338 = vmatprep.mubr.msk.bf16.mxu1 %vm437_vm1, %v2165_v37  ;;  %2378 = vmatprep.mubr.msk.bf16.mxu0 %vm437_vm1, %v2201_v1 }
  0x5f   : > { %2339 = vmatmul.mubr.msk.bf16.gmra.mrb[4].mxu1 %vm437_vm1, %v2166_v12  ;;  %2379 = vmatmul.mubr.msk.bf16.gmra.mrb[4].mxu0 %vm437_vm1, %v2202_v19 }
  0x60   : > { %2384 = vmatprep.mubr.msk.bf16.mxu0 %vm437_vm1, %v2208_v23  ;;  %2394 = vmatprep.mubr.msk.f32.mxu1 %vm437_vm1, %v1663_v58 }
  0x67   : > { %2385 = vmatmul.mubr.msk.bf16.vlgmr.msra.gmra.mrb[0].mxu0 %vm437_vm1, %v2209_v0  ;;  %2395 = vmatmul.mubr.msk.f32.vlgmr.msra.gmra.mrb[8].mxu1 %vm437_vm1, %v1664_v33 }
  0x68   : > { %2397 = vmatprep.mubr.msk.f32.mxu1 %vm437_vm1, %v1665_v18  ;;  %2388 = vmatprep.mubr.msk.bf16.mxu0 %vm437_vm1, %v2210_v44 }
  0x6b   : > { %2398 = vmatmul.mubr.msk.f32.gmra.mrb[10].mxu1 %vm437_vm1, %v1666_v24 }
  0x6c   : > { %2400 = vmatprep.mubr.msk.f32.mxu1 %vm437_vm1, %v1667_v34 }
  0x6f   : > { %2389 = vmatmul.mubr.msk.bf16.gmra.mrb[4].mxu0 %vm437_vm1, %v2211_v62  ;;  %2401 = vmatmul.mubr.msk.f32.gmra.mrb[12].mxu1 %vm437_vm1, %v1668_v3 }
  0x70   : > { %2403 = vmatprep.mubr.msk.f32.mxu1 %vm437_vm1, %v1669_v5 }
  0x73   : > { %2404 = vmatmul.mubr.msk.f32.gmra.mrb[14].mxu1 %vm437_vm1, %v1670_v6 }
 0x12a   : > { %v2336_v39 = vpop.f32.mrb[0].mxu1 }
 0x12b   : > { %v907_v49 = vpop.f32.mrb[1].mxu1 }
 0x12c   : > { %v2337_v55 = vpop.f32.mrb[2].mxu1 }
 0x12d   : > { %v910_v35 = vpop.f32.mrb[3].mxu1 }
 0x132   : > { %v3105_v7 = vpop.f32.mrb[4].mxu1 }
 0x133   : > { %v3107_v8 = vpop.f32.mrb[5].mxu1 }
 0x134   : > { %v3109_v27 = vpop.f32.mrb[6].mxu1 }
 0x135   : > { %v3111_v56 = vpop.f32.mrb[7].mxu1 }
 0x13a   : > { %v2386_v40 = vpop.f32.mrb[0].mxu0  ;;  %v2396_v26 = vpop.f32.mrb[8].mxu1 }
 0x13b   : > { %v2406_v16 = vadd.f32 %v2386_v40, %v2336_v39  ;;  %v1532_v42 = vpop.f32.mrb[1].mxu0  ;;  %1806 = vst.msk [vmem:[%s3118_s15 + $0x8] sm:$0xff] %vm1612_vm6, %v2396_v26  ;;  %v1835_v25 = vmul.f32 %v2396_v26, %v2396_v26  ;;  %v1766_v29 = vpop.f32.mrb[9].mxu1  ;;  %v1814_v30 = vsel %vm1612_vm6, %v2396_v26, 0.0 }
 0x13c   : > { %v2407_v53 = vadd.f32 %v1532_v42, %v907_v49  ;;  %v2387_v43 = vpop.f32.mrb[2].mxu0  ;;  %1805 = vst.msk [vmem:[%s3118_s15] sm:$0xff] %vm1612_vm6, %v1766_v29  ;;  %v1834_v14 = vmul.f32 %v1766_v29, %v1766_v29  ;;  %v1813_v21 = vsel %vm1612_vm6, %v1766_v29, 0.0 }
 0x13d   : > { %v2242_v22 = vpack.c.bf16 %v2406_v16, %v2406_v16  ;;  %v1636_v60 = vmul.f32 %v2406_v16, %v2406_v16  ;;  %v2408_v51 = vadd.f32 %v2387_v43, %v2337_v55  ;;  %v1535_v31 = vpop.f32.mrb[3].mxu0  ;;  %v1843_v48 = vsel %vm1612_vm6, %v1835_v25, 0.0 }
 0x13e   : > { %v2240_v36 = vpack.c.bf16 %v2407_v53, %v2407_v53  ;;  %v2399_v57 = vpop.f32.mrb[10].mxu1  ;;  %v1616_v20 = vsel %vm1612_vm6, %v2406_v16, 0.0  ;;  %v1613_v45 = vsel %vm1612_vm6, %v2407_v53, 0.0  ;;  %v1634_v59 = vmul.f32 %v2407_v53, %v2407_v53 }
 0x13f   : > { %1606 = vst.msk [vmem:[%s3126_s20 + $0x8] sm:$0xf] %vm1603_vm7, %v2242_v22  ;;  %v2243_v46 = vpack.c.bf16 %v2408_v51, %v2408_v51  ;;  %v1776_v54 = vpop.f32.mrb[11].mxu1  ;;  %v2409_v17 = vadd.f32 %v1535_v31, %v910_v35  ;;  %v1815_v38 = vadd.f32 %v1814_v30, %v1813_v21  ;;  %v1842_v52 = vsel %vm1612_vm6, %v1834_v14, 0.0 }
 0x140   : > { %1808 = vst.msk [vmem:[%s3118_s15 + $0x18] sm:$0xff] %vm1612_vm6, %v2399_v57  ;;  %1807 = vst.msk [vmem:[%s3118_s15 + $0x10] sm:$0xff] %vm1612_vm6, %v1776_v54  ;;  %v1645_v15 = vsel %vm1612_vm6, %v1636_v60, 0.0  ;;  %v1637_v13 = vmul.f32 %v2408_v51, %v2408_v51  ;;  %v1844_v28 = vadd.f32 %v1843_v48, %v1842_v52  ;;  %v1837_v47 = vmul.f32 %v2399_v57, %v2399_v57 }
 0x141   : > { %1604 = vst.msk [vmem:[%s3126_s20] sm:$0xf] %vm1603_vm7, %v2240_v36  ;;  %1607 = vst.msk [vmem:[%s3126_s20 + $0xc] sm:$0xf] %vm1603_vm7, %v2243_v46  ;;  %v2241_v63 = vpack.c.bf16 %v2409_v17, %v2409_v17  ;;  %v1614_v50 = vsel %vm1612_vm6, %v2409_v17, 0.0  ;;  %v1635_v2 = vmul.f32 %v2409_v17, %v2409_v17  ;;  %v1816_v61 = vsel %vm1612_vm6, %v1776_v54, 0.0 }
 0x142   : > { %v2390_v41 = vpop.f32.mrb[4].mxu0  ;;  %v2402_v4 = vpop.f32.mrb[12].mxu1  ;;  %v1618_v9 = vsel %vm1612_vm6, %v2408_v51, 0.0  ;;  %v1615_v10 = vadd.f32 %v1614_v50, %v1613_v45  ;;  %v1817_v32 = vadd.f32 %v1816_v61, %v1815_v38  ;;  %v1836_v37 = vmul.f32 %v1776_v54, %v1776_v54 }
 0x143   : > { %1810 = vst.msk [vmem:[%s3118_s15 + $0x28] sm:$0xff] %vm1612_vm6, %v2402_v4  ;;  %v1548_v1 = vpop.f32.mrb[5].mxu0  ;;  %v1786_v11 = vpop.f32.mrb[13].mxu1  ;;  %v1642_v12 = vsel %vm1612_vm6, %v1634_v59, 0.0  ;;  %v1643_v19 = vsel %vm1612_vm6, %v1635_v2, 0.0  ;;  %v1818_v23 = vsel %vm1612_vm6, %v2399_v57, 0.0  ;;  %v2410_v58 = vadd.f32 %v2390_v41, %v3105_v7 }
 0x144   : > { %1605 = vst.msk [vmem:[%s3126_s20 + $0x4] sm:$0xf] %vm1603_vm7, %v2241_v63  ;;  %v2391_v0 = vpop.f32.mrb[6].mxu0  ;;  %v1617_v33 = vadd.f32 %v1616_v20, %v1615_v10  ;;  %v1644_v44 = vadd.f32 %v1643_v19, %v1642_v12  ;;  %v1845_v18 = vsel %vm1612_vm6, %v1836_v37, 0.0  ;;  %v2411_v24 = vadd.f32 %v1548_v1, %v3107_v8 }
 0x145   : > { %1809 = vst.msk [vmem:[%s3118_s15 + $0x20] sm:$0xff] %vm1612_vm6, %v1786_v11  ;;  %v1551_v34 = vpop.f32.mrb[7].mxu0  ;;  %v1647_v62 = vsel %vm1612_vm6, %v1637_v13, 0.0  ;;  %v1847_v3 = vsel %vm1612_vm6, %v1837_v47, 0.0  ;;  %v1846_v5 = vadd.f32 %v1845_v18, %v1844_v28  ;;  %v2246_v6 = vpack.c.bf16 %v2410_v58, %v2410_v58 }
 0x146   : > { %v2405_v39 = vpop.f32.mrb[14].mxu1  ;;  %v1646_v49 = vadd.f32 %v1645_v15, %v1644_v44  ;;  %v1822_v55 = vsel %vm1612_vm6, %v2402_v4, 0.0  ;;  %v2244_v35 = vpack.c.bf16 %v2411_v24, %v2411_v24  ;;  %v1619_v7 = vadd.f32 %v1618_v9, %v1617_v33 }
 0x147   : > { %1812 = vst.msk [vmem:[%s3118_s15 + $0x38] sm:$0xff] %vm1612_vm6, %v2405_v39  ;;  %v1796_v40 = vpop.f32.mrb[15].mxu1  ;;  %v1839_v8 = vmul.f32 %v2402_v4, %v2402_v4  ;;  %v1620_v26 = vsel %vm1612_vm6, %v2411_v24, 0.0  ;;  %v1638_v16 = vmul.f32 %v2411_v24, %v2411_v24  ;;  %v1819_v42 = vadd.f32 %v1818_v23, %v1817_v32 }
 0x148   : > { %1610 = vst.msk [vmem:[%s3126_s20 + $0x18] sm:$0xf] %vm1603_vm7, %v2246_v6  ;;  %1608 = vst.msk [vmem:[%s3126_s20 + $0x10] sm:$0xf] %vm1603_vm7, %v2244_v35  ;;  %v1621_v25 = vadd.f32 %v1620_v26, %v1619_v7  ;;  %v1648_v29 = vadd.f32 %v1647_v62, %v1646_v49  ;;  %v1820_v53 = vsel %vm1612_vm6, %v1786_v11, 0.0  ;;  %v1838_v43 = vmul.f32 %v1786_v11, %v1786_v11 }
 0x149   : > { %1811 = vst.msk [vmem:[%s3118_s15 + $0x30] sm:$0xff] %vm1612_vm6, %v1796_v40  ;;  %v1649_v30 = vsel %vm1612_vm6, %v1638_v16, 0.0  ;;  %v1821_v14 = vadd.f32 %v1820_v53, %v1819_v42  ;;  %v1848_v22 = vadd.f32 %v1847_v3, %v1846_v5  ;;  %v2412_v60 = vadd.f32 %v2391_v0, %v3109_v27  ;;  %s2639_s15 = smov [#allocation2]  }
 0x14a   : > { %v1624_v51 = vsel %vm1612_vm6, %v2410_v58, 0.0  ;;  %v1650_v31 = vadd.f32 %v1649_v30, %v1648_v29  ;;  %v1849_v21 = vsel %vm1612_vm6, %v1838_v43, 0.0  ;;  %v2413_v36 = vadd.f32 %v1551_v34, %v3111_v56  ;;  %s2563_s16 = sshll.u32 %s2639_s15, 4  ;;  %s2564_s16 = int_to_ptr.vmem [resolvable:$false] %s2563_s16 }
 0x14b   : > { %v1640_v48 = vmul.f32 %v2410_v58, %v2410_v58  ;;  %v1851_v57 = vsel %vm1612_vm6, %v1839_v8, 0.0  ;;  %v1850_v20 = vadd.f32 %v1849_v21, %v1848_v22  ;;  %v2247_v45 = vpack.c.bf16 %v2412_v60, %v2412_v60  ;;  %s2565_s18 = scalar_lea.vmem %s2564_s16, 128  ;;  %p2566_p1 = scmp.lt.s32.totalorder %s3204_s11, %s2564_s16 }
 0x14c   : > { %v2245_v46 = vpack.c.bf16 %v2413_v36, %v2413_v36  ;;  %v1622_v54 = vsel %vm1612_vm6, %v2413_v36, 0.0  ;;  %v1639_v59 = vmul.f32 %v2413_v36, %v2413_v36  ;;  %v1841_v17 = vmul.f32 %v2405_v39, %v2405_v39  ;;  %p2567_p2 = scmp.lt.s32.totalorder %s2565_s18, %s2559_s14 }
 0x14d   : > { %1611 = vst.msk [vmem:[%s3126_s20 + $0x1c] sm:$0xf] %vm1603_vm7, %v2247_v45  ;;  %v1623_v27 = vadd.f32 %v1622_v54, %v1621_v25  ;;  %v1826_v38 = vsel %vm1612_vm6, %v2405_v39, 0.0  ;;  %v1823_v52 = vadd.f32 %v1822_v55, %v1821_v14  ;;  %v1824_v15 = vsel %vm1612_vm6, %v1796_v40, 0.0 }
 0x14e   : > { %v1641_v13 = vmul.f32 %v2412_v60, %v2412_v60  ;;  %1609 = vst.msk [vmem:[%s3126_s20 + $0x14] sm:$0xf] %vm1603_vm7, %v2245_v46  ;;  %v1651_v56 = vsel %vm1612_vm6, %v1639_v59, 0.0  ;;  %v1840_v28 = vmul.f32 %v1796_v40, %v1796_v40  ;;  %v1852_v47 = vadd.f32 %v1851_v57, %v1850_v20  ;;  %p2568_p3 = por %p2567_p2, %p2566_p1 }
 0x14f   : > { %v1625_v63 = vadd.f32 %v1624_v51, %v1623_v27  ;;  %v1652_v50 = vadd.f32 %v1651_v56, %v1650_v31  ;;  %v1825_v2 = vadd.f32 %v1824_v15, %v1823_v52  ;;  %v1653_v61 = vsel %vm1612_vm6, %v1640_v48, 0.0 }
 0x150   : > { %v1626_v41 = vsel %vm1612_vm6, %v2412_v60, 0.0  ;;  %v1855_v4 = vsel %vm1612_vm6, %v1841_v17, 0.0  ;;  %v1853_v9 = vsel %vm1612_vm6, %v1840_v28, 0.0  ;;  %v1655_v11 = vsel %vm1612_vm6, %v1641_v13, 0.0  ;;  %p2569_p5 = pnand %p2568_p3, %p2562_p0 }
 0x151   : > { %v1627_v10 = vadd.f32 %v1626_v41, %v1625_v63  ;;  %v1654_v32 = vadd.f32 %v1653_v61, %v1652_v50  ;;  %v1827_v37 = vadd.f32 %v1826_v38, %v1825_v2  ;;  %v1854_v1 = vadd.f32 %v1853_v9, %v1852_v47 }
 0x153   : > { %v1628_v12 = vrot.slane %v1627_v10, 4  ;;  %v1656_v19 = vadd.f32 %v1655_v11, %v1654_v32  ;;  %v1828_v23 = vrot.slane %v1827_v37, 4  ;;  %v1856_v58 = vadd.f32 %v1855_v4, %v1854_v1 }
 0x155   : > { %v1629_v0 = vadd.f32 %v1628_v12, %v1627_v10  ;;  %v1657_v33 = vrot.slane %v1656_v19, 4  ;;  %v1829_v44 = vadd.f32 %v1828_v23, %v1827_v37  ;;  %v1857_v18 = vrot.slane %v1856_v58, 4 }
 0x157   : > { %v1630_v24 = vrot.slane %v1629_v0, 2  ;;  %v1658_v34 = vadd.f32 %v1657_v33, %v1656_v19  ;;  %v1830_v62 = vrot.slane %v1829_v44, 2  ;;  %v1858_v3 = vadd.f32 %v1857_v18, %v1856_v58 }
 0x159   : > { %v1631_v5 = vadd.f32 %v1630_v24, %v1629_v0  ;;  %v1659_v6 = vrot.slane %v1658_v34, 2  ;;  %v1831_v39 = vadd.f32 %v1830_v62, %v1829_v44  ;;  %v1859_v49 = vrot.slane %v1858_v3, 2 }
 0x15b   : > { %v1632_v55 = vrot.slane %v1631_v5, 1  ;;  %v1660_v35 = vadd.f32 %v1659_v6, %v1658_v34  ;;  %v1860_v7 = vadd.f32 %v1859_v49, %v1858_v3  ;;  %v1832_v40 = vrot.slane %v1831_v39, 1 }
 0x15d   : > { %v1661_v8 = vrot.slane %v1660_v35, 1  ;;  %v1861_v26 = vrot.slane %v1860_v7, 1  ;;  %v1633_v16 = vadd.f32 %v1632_v55, %v1631_v5  ;;  %v1833_v25 = vadd.f32 %v1832_v40, %v1831_v39 }
 0x15f   : > { %v1662_v42 = vadd.f32 %v1661_v8, %v1660_v35  ;;  %v1862_v29 = vadd.f32 %v1861_v26, %v1860_v7 }
 0x161   : > { %v1864_v53 = vsel %vm1863_vm8, %v1633_v16, %v1662_v42 }
 0x162   : > { %v1865_v43 = vsel %vm450_vm0, %v1864_v53, %v1833_v25 }
 0x163   : > { %v1867_v30 = vsel %vm1866_vm9, %v1865_v43, %v1862_v29 }
 0x164   : > { %1868 = vst.msk [vmem:[%s324_s8] sm:$0xf] %vm1603_vm7, %v1867_v30 }
 0x165   : > { %2572 = shalt.err (!%p2569_p5)
}
 0x166   : > { %s2573_s19 = scalar_lea.hbm %s3202_s30, 64  ;;  %s2577_s27 = scalar_lea.hbm %s3258_s6, 128 }
 0x167   : > { %p2574_p6 = scmp.ne.s32.totalorder %s3202_s30, %s2573_s19  ;;  %p2578_p10 = scmp.lt.u32.totalorder %s3202_s30, %s3258_s6 }
 0x168   : > { %p2579_p11 = scmp.lt.u32.totalorder %s2577_s27, %s2573_s19  ;;  %p2581_p13 = scmp.lt.u32.totalorder %s2573_s19, %s3202_s30 }
 0x169   : > { %p2575_p7 = pnand %p2574_p6, %p2715_p4 }
 0x16a   : > { %p2580_p12 = por %p2579_p11, %p2578_p10 }
 0x16b   : > { %p2576_p9 = pneg %p2575_p7 }
 0x16c   : > { %p2582_p0 = por %p2581_p13, %p2580_p12 }
 0x16e   : > { %p2583_p1 = pnand %p2582_p0, %p2576_p9 }
 0x170   : > { %2586 = shalt.err (!%p2583_p1)
}
 0x171   : > { %2480 = dma.vmem_to_hbm [thread:$0]  (%p2715_p4), %s3204_s11, 64, %s3202_s30, %s1886_s24  }
 0x172 PF: > { %p2486_p2 = scmp.ge.s32.totalorder %s2637_s26, 2  ;;  %s1940_s12 = sand.u32 1, %s2617_s21  }
 0x173   : > { %s1941_s13 = scalar_lea.sflag [#allocation3], %s1940_s12 }
 0x174   : > { %p2483_p3 = pnand %p2486_p2, %p2722_p8 }
 0x176   : > { %2612 = dma.done.wait (!%p2483_p3), %s1941_s13, 64  }
 0x177   : > { %2614 = vsyncadd (!%p2483_p3), %s1941_s13, 4294967232  ;;  %s20_s26 = sadd.s32 1, %s2637_s26   ;;  %s3263_s21 = smov %s2621_s22 }
 0x178   : > { %p17_p5 = scmp.ge.s32.totalorder %s20_s26, 4   ;;  %s3264_s22 = smov %s2625_s23 }
 0x179   : > { %s3265_s23 = smov %s2728_s10  ;;  %s3266_s24 = smov %s2633_s25 }
 0x17a   : > { %s3267_s25 = smov %s3269_s29  ;;  %19 = sbr.rel (!%p17_p5) target bundleno = 4 (0x4), region = 115 }
 0x181   :  { %1946 = vsyncpa [#allocation3], 1 }
 0x182   :  { %1948 = vsyncpa [#allocation3 + $0x1], 1 }

</bundles_post_ra>
